<compile_context>
chip_gen: v6e
topology: v6e:2x2x1
jax: 0.10.0
libtpu: 0.0.40
codegen_flags: <defaults>
</compile_context>

<pallas_src>
import functools
import math

import jax
import jax.numpy as jnp
from jax.experimental import pallas as pl
from jax.experimental.pallas import tpu as pltpu


_LANES = 128            # vreg lane width
_SUBLANES = 8           # vreg sublane count
_MAX_BLOCK_ROWS = 4096  # 4096 x 128 f32 = 2 MiB per block (~4 MiB double-buffered)


def _fused_acgan_loss_kernel(
    pid_ref,        # SMEM (n_chunks,) int32 : chunk -> param index (scalar prefetch)
    rf_pred_ref,    # VMEM (rf_rows, 128)    : real/fake probs, lane-dense, padded with 1.0
    rf_tgt_ref,     # VMEM (rf_rows, 128)    : real/fake targets, padded with 1.0
    cls_pred_ref,   # VMEM (N, C)            : class logits
    cls_tgt_ref,    # VMEM (N, 1) int32      : class labels
    pbuf_ref,       # VMEM (block_rows, 128) : current chunk of the packed parameter buffer
    out_ref,        # VMEM (1, 128) f32      : scalar result broadcast across lanes
    sos_ref,        # VMEM (1, p_lanes) f32  : per-parameter sum-of-squares accumulator
    *, n_valid, l2_reg_lambda):
    k = pl.program_id(0)
    n_chunks = pl.num_programs(0)

    @pl.when(k == 0)
    def _init():
        sos_ref[...] = jnp.zeros_like(sos_ref)

    # ---- per-chunk L2 partial: accumulate sum(p^2) into this chunk's param lane ----
    v = pbuf_ref[...].astype(jnp.float32)          # cast up in-kernel (VPU, hidden under DMA)
    sos = jnp.sum(v * v)                           # zero padding keeps this exact
    pid = pid_ref[k]                               # SMEM scalar read
    lane = jax.lax.broadcasted_iota(jnp.int32, sos_ref.shape, 1)
    sos_ref[...] += jnp.where(lane == pid, sos, 0.0)

    @pl.when(k == n_chunks - 1)
    def _finalize():
        # --- BCE (PyTorch clamps log terms at -100). Padding (pred=1, tgt=1)
        #     contributes exactly 0, so no validity mask is required. ---
        p = rf_pred_ref[...].astype(jnp.float32)
        t = rf_tgt_ref[...].astype(jnp.float32)
        log_p = jnp.maximum(jnp.log(p), -100.0)
        log_1mp = jnp.maximum(jnp.log(1.0 - p), -100.0)
        bce = -(t * log_p + (1.0 - t) * log_1mp)
        bce_loss = jnp.sum(bce) * (1.0 / n_valid)

        # --- CrossEntropy = mean(-log_softmax(logits)[i, target[i]]) ---
        logits = cls_pred_ref[...].astype(jnp.float32)
        m = jnp.max(logits, axis=-1, keepdims=True)
        shifted = logits - m
        lse = jnp.log(jnp.sum(jnp.exp(shifted), axis=-1, keepdims=True))
        logprob = shifted - lse
        col = jax.lax.broadcasted_iota(jnp.int32, logits.shape, 1)
        onehot = (col == cls_tgt_ref[...]).astype(jnp.float32)
        ce_loss = -jnp.sum(onehot * logprob) * (1.0 / n_valid)

        # --- L2 regularizer: sum_p sqrt(sum(p^2)); unused lanes are 0 -> sqrt(0)=0 ---
        l2 = jnp.sum(jnp.sqrt(sos_ref[...]))

        total = bce_loss + ce_loss + l2_reg_lambda * l2
        out_ref[...] = jnp.broadcast_to(total, out_ref.shape)


def acgan_loss(real_fake_pred, real_fake_target, class_pred, class_target,
               model_params, l2_reg_lambda=0.01, block_rows=None):
    n, c = class_pred.shape
    if not model_params:
        model_params = [jnp.zeros((_LANES,), jnp.float32)]   # contributes 0 to the norm

    # ---- lane-dense repack of the (N,1) real/fake head: (ceil(N/128), 128) ----
    # Padding with pred=1.0 / target=1.0 gives an exact-zero BCE contribution,
    # so the kernel needs no mask.
    n_pad = pl.cdiv(n, _LANES) * _LANES
    rf_rows = n_pad // _LANES
    rf_pred = jnp.pad(real_fake_pred.reshape(-1), (0, n_pad - n),
                      constant_values=1.0).reshape(rf_rows, _LANES)
    rf_tgt = jnp.pad(real_fake_target.reshape(-1), (0, n_pad - n),
                     constant_values=1.0).reshape(rf_rows, _LANES)
    cls_tgt = class_target.reshape(n, 1).astype(jnp.int32)

    # ---- pack all params (native dtype, no wrapper upcast) into one chunk-aligned buffer ----
    pdtype = jnp.result_type(*[p.dtype for p in model_params])
    if block_rows is None:
        max_elems = max(int(math.prod(p.shape)) for p in model_params)
        rows_needed = pl.cdiv(max(max_elems, 1), _LANES)
        rows_needed = pl.cdiv(rows_needed, _SUBLANES) * _SUBLANES
        block_rows = int(min(_MAX_BLOCK_ROWS, rows_needed))
    chunk_elems = block_rows * _LANES

    pieces, chunk_param_id = [], []
    for i, p in enumerate(model_params):
        flat = p.reshape(-1).astype(pdtype)
        n_chunks_p = int(pl.cdiv(flat.size, chunk_elems))
        if n_chunks_p == 0:
            continue
        pieces.append(jnp.pad(flat, (0, n_chunks_p * chunk_elems - flat.size)))
        chunk_param_id += [i] * n_chunks_p
    if not chunk_param_id:                       # all params empty: dummy zero chunk
        pieces.append(jnp.zeros((chunk_elems,), pdtype))
        chunk_param_id.append(0)
    packed = jnp.concatenate(pieces).reshape(-1, _LANES)
    param_id = jnp.asarray(chunk_param_id, dtype=jnp.int32)
    n_chunks = len(chunk_param_id)
    p_lanes = int(pl.cdiv(len(model_params), _LANES) * _LANES)

    kernel = functools.partial(_fused_acgan_loss_kernel,
                               n_valid=int(n),
                               l2_reg_lambda=float(l2_reg_lambda))

    out = pl.pallas_call(
        kernel,
        out_shape=jax.ShapeDtypeStruct((1, _LANES), jnp.float32),
        grid_spec=pltpu.PrefetchScalarGridSpec(
            num_scalar_prefetch=1,
            grid=(n_chunks,),
            in_specs=[
                # small resident blocks (constant index_map -> DMA'd once, stay in VMEM)
                pl.BlockSpec((rf_rows, _LANES), lambda k, pid: (0, 0)),
                pl.BlockSpec((rf_rows, _LANES), lambda k, pid: (0, 0)),
                pl.BlockSpec((n, c), lambda k, pid: (0, 0)),
                pl.BlockSpec((n, 1), lambda k, pid: (0, 0)),
                # parameter sweep: one (block_rows, 128) chunk per grid step
                pl.BlockSpec((block_rows, _LANES), lambda k, pid: (k, 0)),
            ],
            out_specs=pl.BlockSpec((1, _LANES), lambda k, pid: (0, 0)),
            scratch_shapes=[pltpu.VMEM((1, p_lanes), jnp.float32)],
        ),
        compiler_params=pltpu.CompilerParams(
            dimension_semantics=("arbitrary",)),   # sequential accumulation axis
    )(param_id, rf_pred, rf_tgt, class_pred, cls_tgt, packed)
    return out[0, 0]


if __name__ == "__main__":
    key = jax.random.PRNGKey(0)
    N, C, H = 8, 4, 32   # batch, num_classes, hidden dim of synthetic discriminator

    k1, k2, k3, k4, k5, k6, k7, k8, k9, k10 = jax.random.split(key, 10)

    # Discriminator outputs (probabilities for real/fake, logits for classes).
    real_fake_pred = jax.nn.sigmoid(jax.random.normal(k1, (N, 1), jnp.float32))
    real_fake_target = jax.random.bernoulli(k2, 0.5, (N, 1)).astype(jnp.float32)
    class_pred = jax.random.normal(k3, (N, C), jnp.float32)
    class_target = jax.random.randint(k4, (N,), 0, C, jnp.int32)

    # Deterministic synthetic discriminator parameters (for L2 regularization).
    model_params = [
        0.1 * jax.random.normal(k5, (16, H), jnp.float32),   # embedding-ish
        0.1 * jax.random.normal(k6, (H, H), jnp.float32),    # hidden weight
        0.01 * jax.random.normal(k7, (H,), jnp.float32),     # hidden bias
        0.1 * jax.random.normal(k8, (H, 1), jnp.float32),    # real/fake head W
        0.01 * jax.random.normal(k9, (1,), jnp.float32),     # real/fake head b
        0.1 * jax.random.normal(k10, (H, C), jnp.float32),   # class head W
    ]

    total = acgan_loss(real_fake_pred, real_fake_target,
                       class_pred, class_target,
                       model_params, l2_reg_lambda=0.01)
    total = jax.block_until_ready(total)

    # Pure-JAX reference check (same math, no Pallas).
    bce_ref = jnp.mean(-(real_fake_target *
                         jnp.maximum(jnp.log(real_fake_pred), -100.0)
                         + (1.0 - real_fake_target) *
                         jnp.maximum(jnp.log(1.0 - real_fake_pred), -100.0)))
    logp_ref = jax.nn.log_softmax(class_pred, axis=-1)
    ce_ref = -jnp.mean(logp_ref[jnp.arange(N), class_target])
    l2_ref = sum(jnp.sqrt(jnp.sum(p.astype(jnp.float32) ** 2))
                 for p in model_params)
    ref = bce_ref + ce_ref + 0.01 * l2_ref
    assert jnp.allclose(total, ref, rtol=1e-5, atol=1e-5), (total, ref)

    print("KERNEL_OK")
</pallas_src>

<mosaic_0001>
module attributes {stable_mosaic.version = 11 : i64} {
  func.func @_fused_acgan_loss_kernel(%arg0: i32, %arg1: memref<6xi32, #tpu.memory_space<smem>>, %arg2: memref<1x128xf32, #tpu.memory_space<vmem>>, %arg3: memref<1x128xf32, #tpu.memory_space<vmem>>, %arg4: memref<8x4xf32, #tpu.memory_space<vmem>>, %arg5: memref<8x1xi32, #tpu.memory_space<vmem>>, %arg6: memref<8x128xf32, #tpu.memory_space<vmem>>, %arg7: memref<1x128xf32, #tpu.memory_space<vmem>>, %arg8: memref<1x128xf32, #tpu.memory_space<vmem>>) attributes {dimension_semantics = [#tpu.dimension_semantics<arbitrary>], iteration_bounds = array<i64: 6>, scalar_prefetch = 1 : i64, scratch_operands = 1 : i64, tpu.core_type = #tpu.core_type<tc>, window_params = [{pipeline_mode = #tpu.pipeline_mode<synchronous>, transform_indices = @transform_0, window_bounds = array<i64: 1, 128>}, {pipeline_mode = #tpu.pipeline_mode<synchronous>, transform_indices = @transform_1, window_bounds = array<i64: 1, 128>}, {pipeline_mode = #tpu.pipeline_mode<synchronous>, transform_indices = @transform_2, window_bounds = array<i64: 8, 4>}, {pipeline_mode = #tpu.pipeline_mode<synchronous>, transform_indices = @transform_3, window_bounds = array<i64: 8, 1>}, {transform_indices = @transform_4, window_bounds = array<i64: 8, 128>}, {pipeline_mode = #tpu.pipeline_mode<synchronous>, transform_indices = @transform_5, window_bounds = array<i64: 1, 128>}]} {
    %c0_i32 = arith.constant 0 : i32
    %0 = arith.cmpi eq, %arg0, %c0_i32 : i32
    %1 = arith.extui %0 : i1 to i32
    %c0_i32_0 = arith.constant 0 : i32
    %2 = arith.cmpi ne, %1, %c0_i32_0 : i32
    scf.if %2 {
      %cst_8 = arith.constant 0.000000e+00 : f32
      %23 = vector.broadcast %cst_8 : f32 to vector<1x128xf32>
      %c0_9 = arith.constant 0 : index
      %c0_10 = arith.constant 0 : index
      %24 = vector.load %arg8[%c0_9, %c0_10] : memref<1x128xf32, #tpu.memory_space<vmem>>, vector<1x128xf32>
      tpu.vector_store %arg8[%c0_9, %c0_10], %23 {strides = array<i32>} : memref<1x128xf32, #tpu.memory_space<vmem>>, vector<1x128xf32>,
    } else {
    }
    %c0 = arith.constant 0 : index
    %c0_1 = arith.constant 0 : index
    %3 = vector.load %arg6[%c0, %c0_1] : memref<8x128xf32, #tpu.memory_space<vmem>>, vector<8x128xf32>
    %4 = arith.mulf %3, %3 : vector<8x128xf32>
    %5 = vector.shape_cast %4 : vector<8x128xf32> to vector<1x8x128xf32>
    %cst = arith.constant dense<0.000000e+00> : vector<1xf32>
    %6 = vector.multi_reduction <add>, %5, %cst [1, 2] : vector<1x8x128xf32> to vector<1xf32>
    %7 = vector.shape_cast %6 : vector<1xf32> to vector<1x1x1xf32>
    %8 = vector.extract %7[0, 0, 0] : f32 from vector<1x1x1xf32>
    %9 = arith.index_cast %arg0 : i32 to index
    %10 = memref.load %arg1[%9] : memref<6xi32, #tpu.memory_space<smem>>
    %11 = tpu.iota {dimensions = array<i32: 1>} : vector<1x128xi32>
    %c0_2 = arith.constant 0 : index
    %c0_3 = arith.constant 0 : index
    %12 = vector.load %arg8[%c0_2, %c0_3] : memref<1x128xf32, #tpu.memory_space<vmem>>, vector<1x128xf32>
    %13 = vector.broadcast %10 : i32 to vector<1x128xi32>
    %14 = arith.cmpi eq, %11, %13 : vector<1x128xi32>
    %cst_4 = arith.constant 0.000000e+00 : f32
    %15 = vector.broadcast %8 : f32 to vector<1x128xf32>
    %16 = vector.broadcast %cst_4 : f32 to vector<1x128xf32>
    %17 = arith.select %14, %15, %16 : vector<1x128xi1>, vector<1x128xf32>
    %18 = arith.addf %12, %17 : vector<1x128xf32>
    %c0_5 = arith.constant 0 : index
    %c0_6 = arith.constant 0 : index
    %19 = vector.load %arg8[%c0_5, %c0_6] : memref<1x128xf32, #tpu.memory_space<vmem>>, vector<1x128xf32>
    tpu.vector_store %arg8[%c0_5, %c0_6], %18 {strides = array<i32>} : memref<1x128xf32, #tpu.memory_space<vmem>>, vector<1x128xf32>,
    %c5_i32 = arith.constant 5 : i32
    %20 = arith.cmpi eq, %arg0, %c5_i32 : i32
    %21 = arith.extui %20 : i1 to i32
    %c0_i32_7 = arith.constant 0 : i32
    %22 = arith.cmpi ne, %21, %c0_i32_7 : i32
    scf.if %22 {
      %c0_8 = arith.constant 0 : index
      %c0_9 = arith.constant 0 : index
      %23 = vector.load %arg2[%c0_8, %c0_9] : memref<1x128xf32, #tpu.memory_space<vmem>>, vector<1x128xf32>
      %c0_10 = arith.constant 0 : index
      %c0_11 = arith.constant 0 : index
      %24 = vector.load %arg3[%c0_10, %c0_11] : memref<1x128xf32, #tpu.memory_space<vmem>>, vector<1x128xf32>
      %25 = math.log %23 : vector<1x128xf32>
      %cst_12 = arith.constant -1.000000e+02 : f32
      %26 = vector.broadcast %cst_12 : f32 to vector<1x128xf32>
      %27 = arith.maximumf %25, %26 : vector<1x128xf32>
      %cst_13 = arith.constant 1.000000e+00 : f32
      %28 = vector.broadcast %cst_13 : f32 to vector<1x128xf32>
      %29 = arith.subf %28, %23 : vector<1x128xf32>
      %30 = math.log %29 : vector<1x128xf32>
      %cst_14 = arith.constant -1.000000e+02 : f32
      %31 = vector.broadcast %cst_14 : f32 to vector<1x128xf32>
      %32 = arith.maximumf %30, %31 : vector<1x128xf32>
      %33 = arith.mulf %24, %27 : vector<1x128xf32>
      %cst_15 = arith.constant 1.000000e+00 : f32
      %34 = vector.broadcast %cst_15 : f32 to vector<1x128xf32>
      %35 = arith.subf %34, %24 : vector<1x128xf32>
      %36 = arith.mulf %35, %32 : vector<1x128xf32>
      %37 = arith.addf %33, %36 : vector<1x128xf32>
      %cst_16 = arith.constant 0.000000e+00 : f32
      %38 = vector.broadcast %cst_16 : f32 to vector<1x128xf32>
      %39 = arith.subf %38, %37 : vector<1x128xf32>
      %40 = vector.shape_cast %39 : vector<1x128xf32> to vector<1x1x128xf32>
      %cst_17 = arith.constant dense<0.000000e+00> : vector<1xf32>
      %41 = vector.multi_reduction <add>, %40, %cst_17 [1, 2] : vector<1x1x128xf32> to vector<1xf32>
      %42 = vector.shape_cast %41 : vector<1xf32> to vector<1x1x1xf32>
      %43 = vector.extract %42[0, 0, 0] : f32 from vector<1x1x1xf32>
      %cst_18 = arith.constant 1.250000e-01 : f32
      %44 = arith.mulf %43, %cst_18 : f32
      %c0_19 = arith.constant 0 : index
      %c0_20 = arith.constant 0 : index
      %45 = vector.load %arg4[%c0_19, %c0_20] : memref<8x4xf32, #tpu.memory_space<vmem>>, vector<8x4xf32>
      %cst_21 = arith.constant dense<0xFF800000> : vector<8xf32>
      %46 = vector.multi_reduction <maximumf>, %45, %cst_21 [1] : vector<8x4xf32> to vector<8xf32>
      %47 = vector.shape_cast %46 : vector<8xf32> to vector<8x1xf32>
      %48 = vector.broadcast %47 : vector<8x1xf32> to vector<8x4xf32>
      %49 = arith.subf %45, %48 : vector<8x4xf32>
      %50 = math.exp %49 : vector<8x4xf32>
      %cst_22 = arith.constant dense<0.000000e+00> : vector<8xf32>
      %51 = vector.multi_reduction <add>, %50, %cst_22 [1] : vector<8x4xf32> to vector<8xf32>
      %52 = vector.shape_cast %51 : vector<8xf32> to vector<8x1xf32>
      %53 = math.log %52 : vector<8x1xf32>
      %54 = vector.broadcast %53 : vector<8x1xf32> to vector<8x4xf32>
      %55 = arith.subf %49, %54 : vector<8x4xf32>
      %56 = tpu.iota {dimensions = array<i32: 1>} : vector<8x4xi32>
      %c0_23 = arith.constant 0 : index
      %c0_24 = arith.constant 0 : index
      %57 = vector.load %arg5[%c0_23, %c0_24] : memref<8x1xi32, #tpu.memory_space<vmem>>, vector<8x1xi32>
      %58 = vector.broadcast %57 : vector<8x1xi32> to vector<8x4xi32>
      %59 = arith.cmpi eq, %56, %58 : vector<8x4xi32>
      %60 = arith.extui %59 : vector<8x4xi1> to vector<8x4xi32>
      %61 = arith.sitofp %60 : vector<8x4xi32> to vector<8x4xf32>
      %62 = arith.mulf %61, %55 : vector<8x4xf32>
      %63 = vector.shape_cast %62 : vector<8x4xf32> to vector<1x8x4xf32>
      %cst_25 = arith.constant dense<0.000000e+00> : vector<1xf32>
      %64 = vector.multi_reduction <add>, %63, %cst_25 [1, 2] : vector<1x8x4xf32> to vector<1xf32>
      %65 = vector.shape_cast %64 : vector<1xf32> to vector<1x1x1xf32>
      %66 = vector.extract %65[0, 0, 0] : f32 from vector<1x1x1xf32>
      %cst_26 = arith.constant 0.000000e+00 : f32
      %67 = arith.subf %cst_26, %66 : f32
      %cst_27 = arith.constant 1.250000e-01 : f32
      %68 = arith.mulf %67, %cst_27 : f32
      %c0_28 = arith.constant 0 : index
      %c0_29 = arith.constant 0 : index
      %69 = vector.load %arg8[%c0_28, %c0_29] : memref<1x128xf32, #tpu.memory_space<vmem>>, vector<1x128xf32>
      %70 = math.sqrt %69 : vector<1x128xf32>
      %71 = vector.shape_cast %70 : vector<1x128xf32> to vector<1x1x128xf32>
      %cst_30 = arith.constant dense<0.000000e+00> : vector<1xf32>
      %72 = vector.multi_reduction <add>, %71, %cst_30 [1, 2] : vector<1x1x128xf32> to vector<1xf32>
      %73 = vector.shape_cast %72 : vector<1xf32> to vector<1x1x1xf32>
      %74 = vector.extract %73[0, 0, 0] : f32 from vector<1x1x1xf32>
      %75 = arith.addf %44, %68 : f32
      %cst_31 = arith.constant 0.00999999977 : f32
      %76 = arith.mulf %cst_31, %74 : f32
      %77 = arith.addf %75, %76 : f32
      %78 = vector.broadcast %77 : f32 to vector<1x128xf32>
      %c0_32 = arith.constant 0 : index
      %c0_33 = arith.constant 0 : index
      %79 = vector.load %arg7[%c0_32, %c0_33] : memref<1x128xf32, #tpu.memory_space<vmem>>, vector<1x128xf32>
      tpu.vector_store %arg7[%c0_32, %c0_33], %78 {strides = array<i32>} : memref<1x128xf32, #tpu.memory_space<vmem>>, vector<1x128xf32>,
    } else {
    }
    return
  }
  func.func @transform_0(%arg0: i32, %arg1: memref<6xi32, #tpu.memory_space<smem>>) -> (i32, i32) {
    %c0_i32 = arith.constant 0 : i32
    %c0_i32_0 = arith.constant 0 : i32
    %c0_i32_1 = arith.constant 0 : i32
    return %c0_i32, %c0_i32_0 : i32, i32
  }
  func.func @transform_1(%arg0: i32, %arg1: memref<6xi32, #tpu.memory_space<smem>>) -> (i32, i32) {
    %c0_i32 = arith.constant 0 : i32
    %c0_i32_0 = arith.constant 0 : i32
    %c0_i32_1 = arith.constant 0 : i32
    return %c0_i32, %c0_i32_0 : i32, i32
  }
  func.func @transform_2(%arg0: i32, %arg1: memref<6xi32, #tpu.memory_space<smem>>) -> (i32, i32) {
    %c0_i32 = arith.constant 0 : i32
    %c0_i32_0 = arith.constant 0 : i32
    %c0_i32_1 = arith.constant 0 : i32
    return %c0_i32, %c0_i32_0 : i32, i32
  }
  func.func @transform_3(%arg0: i32, %arg1: memref<6xi32, #tpu.memory_space<smem>>) -> (i32, i32) {
    %c0_i32 = arith.constant 0 : i32
    %c0_i32_0 = arith.constant 0 : i32
    %c0_i32_1 = arith.constant 0 : i32
    return %c0_i32, %c0_i32_0 : i32, i32
  }
  func.func @transform_4(%arg0: i32, %arg1: memref<6xi32, #tpu.memory_space<smem>>) -> (i32, i32) {
    %c0_i32 = arith.constant 0 : i32
    %c0_i32_0 = arith.constant 0 : i32
    return %arg0, %c0_i32 : i32, i32
  }
  func.func @transform_5(%arg0: i32, %arg1: memref<6xi32, #tpu.memory_space<smem>>) -> (i32, i32) {
    %c0_i32 = arith.constant 0 : i32
    %c0_i32_0 = arith.constant 0 : i32
    %c0_i32_1 = arith.constant 0 : i32
    return %c0_i32, %c0_i32_0 : i32, i32
  }
}

</mosaic_0001>

<bundles_post_ra>
// kernel: tpu_custom_call.1
= control target key start
LH: loop header
LB: loop body
LE: loop exit
PB: predicated region body
PF: predicated region fallthrough
CT: control target
= control target key end

     0   :  { %s766_s0 = inlined_call_operand.vmem [shape: s32[6], index: 0, kind: input, shape index: {}]   ;;  %s767_s1 = inlined_call_operand.vmem [shape: f32[1,128], index: 1, kind: input, shape index: {}]   ;;  %s768_s2 = inlined_call_operand.vmem [shape: f32[1,128], index: 2, kind: input, shape index: {}]   ;;  %s769_s3 = inlined_call_operand.vmem [shape: f32[8,4], index: 3, kind: input, shape index: {}]   ;;  %s770_s4 = inlined_call_operand.vmem [shape: s32[8,1], index: 4, kind: input, shape index: {}]   ;;  %s771_s5 = inlined_call_operand.hbm [shape: f32[48,128], index: 5, kind: input, shape index: {}]   ;;  %s772_s6 = inlined_call_operand.hbm [shape: f32[1,128], index: 6, kind: output, shape index: {}]  }
   0x1   :  { %s11_s23 = sshll.u32 %s766_s0, 4  ;;  %s12_s23 = int_to_ptr.vmem [resolvable:$true] %s11_s23 }
   0x2   :  { %s489_s24 = scalar_lea.vmem %s12_s23, 16  ;;  %p494_p1 = scmp.lt.s32.totalorder %s12_s23, %s12_s23 }
   0x3   :  { %p490_p0 = scmp.ne.s32.totalorder %s12_s23, %s489_s24  ;;  %p495_p2 = scmp.lt.s32.totalorder %s489_s24, %s489_s24 }
   0x5   :  { %p496_p3 = por %p495_p2, %p494_p1 }
   0x7   :  { %p497_p4 = pnand %p496_p3, %p490_p0 }
   0x9   :  { %500 = shalt.err (!%p497_p4)  }
   0xa   :  { %s595_s25 = smov [#allocation4]  }
   0xb   :  { %14 = dma.vmem_to_smem %s12_s23, 16, %s595_s25, [#allocation3] }
   0xc   :  { %569 = dma.done.wait [#allocation3], 16 }
   0xd   :  { %570 = vsyncadd [#allocation3], 4294967280 }
   0xe   :  { %16 = sfence }
   0xf   :  { %17 = vsyncpa [#allocation6], 0 }
  0x10   :  { %19 = vsyncpa [#allocation6 + $0x1], 0 }
  0x11   :  { %20 = vsyncpa [#allocation7], 0  ;;  %s639_s26 = smov 0   ;;  %s641_s27 = smov 0  }
  0x12   :  { %s643_s0 = smov 0   ;;  %s645_s28 = smov 0  }
  0x13 LB: > { %s658_s29 = sadd.s32 4294967295, %s593_s28   ;;  %s661_s30 = sadd.s32 1, %s593_s28   ;;  %s593_s28 = sphi %s645_s28, %s782_s28   ;;  %s589_s0 = sphi %s643_s0, %s781_s0   ;;  %s585_s27 = sphi %s641_s27, %s780_s27   ;;  %s581_s26 = sphi %s639_s26, %s779_s26  }
  0x14   : > { %s114_s7 = ssub.s32 %s593_s28, %s661_s30  ;;  %s117_s8 = sadd.s32 1, %s589_s0 }
  0x15   : > { %p115_p5 = scmp.eq.s32.totalorder %s114_s7, 0  ;;  %p124_p6 = scmp.ne.s32.totalorder %s589_s0, %s585_s27 }
  0x16   : > { %p125_p7 = scmp.eq.s32.totalorder %s593_s28, 0  ;;  %p130_p8 = scmp.ne.s32.totalorder %s585_s27, %s581_s26 }
  0x17   : > { %s671_s9 = scalar_select %p115_p5, %s589_s0, %s117_s8  }
  0x18   : > { %p126_p9 = por %p125_p7, %p124_p6  ;;  %p131_p10 = scmp.eq.s32.totalorder %s658_s29, 0 }
  0x19   : > { %p437_p11 = scmp.lt.s32.totalorder %s593_s28, 6  ;;  %s187_s11 = sand.u32 1, %s589_s0  }
  0x1a   : > { %p675_p12 = por %p131_p10, %p130_p8  ;;  %s408_s12 = sshll.u32 %s187_s11, 3 }
  0x1b   : > { %s409_s13 = sshll.u32 %s593_s28, 7  ;;  %s191_s17 = scalar_lea.vmem [#allocation5], %s408_s12 }
  0x1c   : > { %s774_s10 = scalar_select %p675_p12, 1, 0 }
  0x1d   : > { %s684_s16 = scalar_lea.hbm %s771_s5, %s409_s13  ;;  %s198_s18 = sshll.u32 %s191_s17, 4  ;;  %s686_s18 = int_to_ptr.vmem [resolvable:$true] %s198_s18 }
  0x1e   : > { %p688_p13 = pnand %p437_p11, %p126_p9  ;;  %s188_s20 = scalar_lea.sflag [#allocation6], %s187_s11 }
  0x1f   : > { %s501_s21 = scalar_lea.hbm %s684_s16, 128  ;;  %s506_s24 = scalar_lea.hbm %s771_s5, 768 }
  0x20   : > { %p502_p2 = scmp.ne.s32.totalorder %s684_s16, %s501_s21  ;;  %p503_p3 = pneg %p688_p13 }
  0x21   : > { %p507_p6 = scmp.lt.s32.totalorder %s684_s16, %s771_s5  ;;  %p508_p7 = scmp.lt.s32.totalorder %s506_s24, %s501_s21 }
  0x22   : > { %p504_p4 = pnand %p503_p3, %p502_p2 }
  0x23   : > { %p509_p8 = por %p508_p7, %p507_p6 }
  0x24   : > { %p505_p5 = pneg %p504_p4 }
  0x26   : > { %p510_p9 = pnand %p509_p8, %p505_p5 }
  0x28   : > { %513 = shalt.err (!%p510_p9)
}
  0x29   : > { %s514_s7 = scalar_lea.vmem %s686_s18, 128  ;;  %s596_s8 = smov [#allocation5]  }
  0x2a   : > { %p515_p10 = scmp.ne.s32.totalorder %s686_s18, %s514_s7  ;;  %s519_s11 = sshll.u32 %s596_s8, 4  ;;  %s520_s11 = int_to_ptr.vmem [resolvable:$false] %s519_s11 }
  0x2b   : > { %s521_s12 = scalar_lea.vmem %s520_s11, 256  ;;  %p522_p4 = scmp.lt.s32.totalorder %s686_s18, %s520_s11 }
  0x2c   : > { %p517_p11 = pnand %p515_p10, %p503_p3  ;;  %p523_p0 = scmp.lt.s32.totalorder %s521_s12, %s514_s7 }
  0x2e   : > { %p518_p2 = pneg %p517_p11  ;;  %p524_p1 = por %p523_p0, %p522_p4 }
  0x30   : > { %p525_p12 = pnand %p524_p1, %p518_p2 }
  0x32   : > { %528 = shalt.err (!%p525_p12)
}
  0x33   : > { %436 = dma.hbm_to_vmem [thread:$0]  (!%p688_p13), %s684_s16, 128, %s686_s18, %s188_s20  }
  0x34   : > { %p776_p5 = scmp.lt.s32.totalorder %s593_s28, 7  ;;  %p777_p6 = scmp.ge.s32.totalorder %s593_s28, 1 }
  0x36   : > { %p204_p3 = pnand %p777_p6, %p776_p5 }
  0x37   : > { %s209_s13 = sand.u32 (!%p204_p3), 1, %s585_s27   ;;  %p778_p0 = scmp.ne.s32.totalorder (!%p204_p3), %s774_s10, 0 }
  0x38   : > { %207 = sbr.rel (%p204_p3) target bundleno = 822 (0x336), region = 40  ;;  %s411_s14 = sshll.u32 (!%p204_p3), %s209_s13, 3 }
  0x39   : > { %s210_s15 = scalar_lea.sflag (!%p204_p3), [#allocation6], %s209_s13  ;;  %s213_s17 = scalar_lea.vmem (!%p204_p3), [#allocation5], %s411_s14 }
  0x3d   : > { %572 = dma.done.wait (%p778_p0), %s210_s15, 128  }
  0x3e   : > { %574 = vsyncadd (%p778_p0), %s210_s15, 4294967168  ;;  %p412_p12 = scmp.ne.s32.totalorder %s658_s29, 0 }
  0x40   : > { %238 = sbr.rel (%p412_p12) target bundleno = 71 (0x47), region = 48 }
  0x45   : > { %v597_v0 = vmov 0.0  }
  0x46   : > { %239 = vst [vmem:[#allocation2] sm:$0x1] %v597_v0 }
  0x47 PF: > { %v240_v1 = vld [vmem:[%s213_s17] sm:$0xff]  ;;  %s251_s28 = sld [smem:[#allocation4 + %s658_s29]]  ;;  %v252_v10 = vlaneseq  ;;  %p413_p13 = scmp.ne.s32.totalorder %s658_s29, 5 }
  0x48   : > { %v241_v2 = vmul.f32 %v240_v1, %v240_v1 }
  0x49   : > { %v253_v11 = vand.u32 127, %v252_v10 }
  0x4a   : > { %242 = vadd.xlane.f32.xlu0 %v241_v2 }
  0x4d   : > { %v255_v12 = vstv %s251_s28  ;;  %v254_v13 = vld [vmem:[#allocation2] sm:$0x1] }
  0x4e   : > { %vm256_vm0 = vcmp.eq.s32.totalorder %v253_v11, %v255_v12 }
  0xd3   : > { %v243_v3 = vpop.xlane.xlu0 %242 }
  0xd4   : > { %v244_v4 = vrot.slane %v243_v3, 4 }
  0xd6   : > { %v245_v5 = vadd.f32 %v244_v4, %v243_v3 }
  0xd8   : > { %v246_v6 = vrot.slane %v245_v5, 2 }
  0xda   : > { %v247_v7 = vadd.f32 %v246_v6, %v245_v5 }
  0xdc   : > { %v248_v8 = vrot.slane %v247_v7, 1 }
  0xde   : > { %v249_v9 = vadd.f32 %v248_v8, %v247_v7 }
  0xe0   : > { %419 = vpush %v249_v9 }
 0x111   : > { %s420_s10 = spop %419 }
 0x112   : > { %v257_v14 = vstv %s420_s10  ;;  %264 = sbr.rel (%p413_p13) target bundleno = 807 (0x327), region = 52 }
 0x113   : > { %v258_v15 = vsel %vm256_vm0, %v257_v14, 0.0 }
 0x114   : > { %v259_v16 = vadd.f32 %v258_v15, %v254_v13 }
 0x116   : > { %260 = vst [vmem:[#allocation2] sm:$0x1] %v259_v16 }
 0x117   : > { %v291_v17 = vld [vmem:[%s769_s3] sm:$0xff]  ;;  %vm292_vm1 = vcmask 31744   ;;  %v598_v20 = vmov 0   ;;  %vm279_vm2 = vcmask 1040384   ;;  %v599_v48 = vmov 0.0  }
 0x118   : > { %v293_v18 = vsel %vm292_vm1, %v291_v17, -inf  ;;  %v305_v19 = vld [vmem:[%s770_s4] sm:$0xff]  ;;  %477 = vset.pattern.permute.xlu1 %v598_v20  ;;  %478 = vset.pattern.permute.xlu0 %v598_v20 }
 0x119   : > { %294 = vmax.xlane.f32.xlu0 %v293_v18  ;;  %307 = vperm.xlu1 %477, %v305_v19   ;;  %v265_v24 = vld [vmem:[%s767_s1] sm:$0x1] }
 0x11a   : > { %v270_v26 = vsub.f32 1.0, %v265_v24  ;;  %v266_v31 = vld [vmem:[%s768_s2] sm:$0x1] }
 0x11b   : > { %v275_v34 = vsub.f32 1.0, %v266_v31 }
 0x11d   : > { %v325_v41 = vld [vmem:[#allocation2] sm:$0x1] }
 0x11e   : > { %vm328_vm4 = vcmp.eq.f32.partialorder %v325_v41, inf  ;;  %v331_v50 = vand.u32 2147483648, %v325_v41  ;;  %vm330_vm5 = vcmp.eq.f32.partialorder %v325_v41, 0.0 }
 0x194   : > { %v308_v44 = vpop.permute.xlu1 %307 }
 0x195   : > { %vm309_vm3 = vcmp.eq.s32.totalorder %v253_v11, %v308_v44 }
 0x196   : > { %v414_v49 = vsel %vm309_vm3, 1.0, %v599_v48 }
 0x1a2   : > { %v295_v21 = vpop.xlane.xlu0 %294 }
 0x1a3   : > { %v296_v22 = vsub.f32 %v291_v17, %v295_v21 }
 0x1a5   : > { %v297_v23 = vmul.f32 1.442695, %v296_v22 }
 0x1a7   : > { %479 = vpow2.f32 %v297_v23 }
 0x1a8   : > { %481 = vlog2.f32 %v265_v24 }
 0x1a9   : > { %483 = vlog2.f32 %v270_v26 }
 0x1aa   : > { %485 = vrsqrt.f32 %v325_v41 }
 0x1b4   : > { %v480_v25 = vpop.eup %479 }
 0x1b5   : > { %v299_v27 = vsel %vm292_vm1, %v480_v25, 0.0  ;;  %v482_v28 = vpop.eup %481 }
 0x1b6   : > { %300 = vadd.xlane.f32.xlu0 %v299_v27  ;;  %v484_v29 = vpop.eup %483  ;;  %v268_v30 = vmul.f32 0.6931472, %v482_v28 }
 0x1b7   : > { %v272_v32 = vmul.f32 0.6931472, %v484_v29  ;;  %v486_v43 = vpop.eup %485 }
 0x1b8   : > { %v269_v33 = vmax.f32 %v268_v30, -100.0  ;;  %v327_v45 = vmul.f32 %v486_v43, %v325_v41 }
 0x1b9   : > { %v273_v35 = vmax.f32 %v272_v32, -100.0 }
 0x1ba   : > { %v274_v36 = vmul.f32 %v269_v33, %v266_v31  ;;  %v329_v52 = vsel %vm328_vm4, %v325_v41, %v327_v45 }
 0x1bb   : > { %v276_v37 = vmul.f32 %v275_v34, %v273_v35  ;;  %v332_v54 = vsel %vm330_vm5, %v331_v50, %v329_v52 }
 0x1bc   : > { %v333_v56 = vsel %vm279_vm2, %v332_v54, 0.0 }
 0x1bd   : > { %v277_v38 = vadd.f32 %v276_v37, %v274_v36 }
 0x1bf   : > { %v278_v39 = vsub.f32 0.0, %v277_v38 }
 0x1c1   : > { %v280_v40 = vsel %vm279_vm2, %v278_v39, 0.0 }
 0x1c2   : > { %281 = vadd.xlane.f32.xlu1 %v280_v40 }
 0x23f   : > { %v301_v42 = vpop.xlane.xlu0 %300 }
 0x240   : > { %487 = vlog2.f32 %v301_v42 }
 0x24b   : > { %v282_v57 = vpop.xlane.xlu1 %281 }
 0x24c   : > { %v283_v58 = vrot.slane %v282_v57, 4 }
 0x24d   : > { %v488_v46 = vpop.eup %487 }
 0x24e   : > { %v303_v47 = vmul.f32 0.6931472, %v488_v46  ;;  %v284_v59 = vadd.f32 %v283_v58, %v282_v57 }
 0x250   : > { %v304_v51 = vsub.f32 %v296_v22, %v303_v47  ;;  %v285_v60 = vrot.slane %v284_v59, 2 }
 0x252   : > { %v312_v53 = vmul.f32 %v414_v49, %v304_v51  ;;  %v286_v61 = vadd.f32 %v285_v60, %v284_v59 }
 0x254   : > { %v313_v55 = vsel %vm292_vm1, %v312_v53, 0.0  ;;  %v287_v62 = vrot.slane %v286_v61, 1 }
 0x255   : > { %314 = vadd.xlane.f32.xlu0 %v313_v55 }
 0x256   : > { %v288_v63 = vadd.f32 %v287_v62, %v286_v61 }
 0x258   : > { %421 = vpush %v288_v63 }
 0x259   : > { %334 = vadd.xlane.f32.xlu0 %v333_v56 }
 0x289   : > { %s422_s25 = spop %421 }
 0x28a   : > { %s290_s8 = smul.f32 0.125, %s422_s25 }
 0x2de   : > { %v315_v0 = vpop.xlane.xlu0 %314 }
 0x2df   : > { %v316_v1 = vrot.slane %v315_v0, 4 }
 0x2e1   : > { %v317_v2 = vadd.f32 %v316_v1, %v315_v0 }
 0x2e2   : > { %v335_v3 = vpop.xlane.xlu0 %334 }
 0x2e3   : > { %v318_v4 = vrot.slane %v317_v2, 2  ;;  %v336_v5 = vrot.slane %v335_v3, 4 }
 0x2e5   : > { %v337_v6 = vadd.f32 %v336_v5, %v335_v3  ;;  %v319_v7 = vadd.f32 %v318_v4, %v317_v2 }
 0x2e7   : > { %v338_v8 = vrot.slane %v337_v6, 2  ;;  %v320_v9 = vrot.slane %v319_v7, 1 }
 0x2e9   : > { %v339_v10 = vadd.f32 %v338_v8, %v337_v6  ;;  %v321_v11 = vadd.f32 %v320_v9, %v319_v7 }
 0x2eb   : > { %423 = vpush %v321_v11  ;;  %v340_v12 = vrot.slane %v339_v10, 1 }
 0x2ed   : > { %v341_v13 = vadd.f32 %v340_v12, %v339_v10 }
 0x2ef   : > { %425 = vpush %v341_v13 }
 0x31c   : > { %s424_s26 = spop %423 }
 0x31d   : > { %s323_s7 = ssub.f32 0.0, %s424_s26 }
 0x31f   : > { %s324_s11 = smul.f32 0.125, %s323_s7 }
 0x320   : > { %s426_s12 = spop %425 }
 0x321   : > { %s343_s13 = sadd.f32 %s324_s11, %s290_s8  ;;  %s344_s14 = smul.f32 0.01, %s426_s12 }
 0x323   : > { %s345_s15 = sadd.f32 %s344_s14, %s343_s13 }
 0x325   : > { %v346_v14 = vstv %s345_s15 }
 0x326   : > { %347 = vst [vmem:[#allocation8] sm:$0x1] %v346_v14 }
 0x327 PF: > { %p438_p1 = scmp.eq.s32.totalorder %s658_s29, 5  ;;  %s600_s17 = smov [#allocation8]  }
 0x328   : > { %s355_s28 = sshll.u32 %s600_s17, 4  ;;  %s356_s28 = int_to_ptr.vmem [resolvable:$true] %s355_s28 }
 0x329   : > { %s529_s10 = scalar_lea.vmem %s356_s28, 16  ;;  %s535_s16 = scalar_lea.vmem %s356_s28, 32 }
 0x32a   : > { %p530_p7 = scmp.ne.s32.totalorder %s356_s28, %s529_s10  ;;  %p536_p10 = scmp.lt.s32.totalorder %s356_s28, %s356_s28 }
 0x32b   : > { %p537_p11 = scmp.lt.s32.totalorder %s535_s16, %s529_s10 }
 0x32c   : > { %p531_p8 = pnand %p530_p7, %p438_p1 }
 0x32d   : > { %p538_p2 = por %p537_p11, %p536_p10 }
 0x32e   : > { %p532_p9 = pneg %p531_p8 }
 0x330   : > { %p539_p4 = pnand %p538_p2, %p532_p9 }
 0x332   : > { %542 = shalt.err (!%p539_p4)
}
 0x333   : > { %430 = dma.vmem_to_hbm [thread:$0]  (%p438_p1), %s356_s28, 16, %s772_s6, [#allocation7]  }
 0x334   : > { %576 = dma.done.wait (%p438_p1), [#allocation7], 16  }
 0x335   : > { %578 = vsyncadd (%p438_p1), [#allocation7], 4294967280 }
 0x336 PF: > { %p23_p5 = scmp.ge.s32.totalorder %s661_s30, 8   ;;  %s779_s26 = smov %s585_s27 }
 0x337   : > { %s780_s27 = smov %s589_s0  ;;  %s781_s0 = smov %s671_s9 }
 0x338   : > { %s782_s28 = smov %s661_s30  ;;  %25 = sbr.rel (!%p23_p5) target bundleno = 19 (0x13), region = 85 }
 0x33d   :  { %368 = vsyncpa [#allocation6], 1 }
 0x33e   :  { %370 = vsyncpa [#allocation6 + $0x1], 1 }
 0x33f   :  { %371 = vsyncpa [#allocation7], 1 }
 0x340   :  { %373 = vsyncpa [#allocation7 + $0x1], 1 }

</bundles_post_ra>
